<compile_context>
chip_gen: v7x
topology: tpu7x:2x2x1
jax: 0.10.0
libtpu: 0.0.40
codegen_flags: <defaults>
</compile_context>

<pallas_src>
import jax
import jax.numpy as jnp
from jax import lax
from jax.experimental import pallas as pl
from jax.experimental.pallas import tpu as pltpu


def fuse_attention_kernel(gamma_ref,   # SMEM (1,)          f32
                          shq_ref,     # VMEM (Cpad, Tq)    bf16  [sh_q ; ones ; 0-pad]
                          keff_ref,    # VMEM (Cpad, N)     bf16  [A @ sh ; r @ sh ; 0-pad]
                          deep_ref,    # VMEM (Cd, N)       bf16  attention operand
                          deepq_ref,   # VMEM (Cd, Tq)      f32   exact residual tile
                          out_ref):    # VMEM (Cd, Tq)      f32
    # energy[i, j] = sum_c shq[c, i] * keff[c, j]
    #             = sh_i^T (Wq^T Wk) sh_j + (bq^T Wk) sh_j
    # (row-constant bias terms are softmax-invariant and were dropped; the
    #  surviving key-side bias row is absorbed into the MXU contraction).
    energy = lax.dot_general(shq_ref[...], keff_ref[...],
                             (((0,), (0,)), ((), ())),
                             preferred_element_type=jnp.float32)        # (Tq, N)

    # Numerically stable row softmax, f32 statistics; exact reciprocal (it is
    # only a (Tq, 1) op, so approx=True buys nothing here).
    m = jnp.max(energy, axis=-1, keepdims=True)
    p = jnp.exp(energy - m)
    denom = jnp.sum(p, axis=-1, keepdims=True)
    att = (p * (1.0 / denom)).astype(jnp.bfloat16)                      # (Tq, N)

    # out[c, i] = sum_j deep[c, j] * att[i, j]  -- transpose-free dot_general.
    out = lax.dot_general(deep_ref[...], att,
                          (((1,), (1,)), ((), ())),
                          preferred_element_type=jnp.float32)           # (Cd, Tq)

    out_ref[...] = gamma_ref[0] * out + deepq_ref[...]


def _vmem_capacity_bytes():
    try:
        return int(pltpu.get_tpu_info().vmem_capacity_bytes)
    except Exception:
        # Conservative fallback: v7x per-TensorCore VMEM.
        return 64 * 1024 * 1024


def fuse_attention(deep, shallow, wq, bq, wk, bk, gamma, *, tq=None):
    """deep: (B, Cd, H, W), shallow: (B, Cs, H, W) -> (B, Cd, H, W).

    bk only contributes softmax-invariant (row-constant) terms to the energy,
    so it is accepted for interface parity but unused.
    """
    del bk
    B, Cd, H, W = deep.shape
    _, Cs, Hs, Ws = shallow.shape
    assert (H, W) == (Hs, Ws)
    N = H * W

    # Augmented channel count: Cs (query features) + 1 (bias row), zero-padded
    # to a sublane multiple so the contraction dim carries no garbage rows.
    Cs1 = Cs + 1
    Cpad = ((Cs1 + 7) // 8) * 8
    pad = Cpad - Cs1

    vmem_cap = int(_vmem_capacity_bytes() * 0.85)   # leave compiler headroom

    def vmem_need(t):
        # Resident (index fixed over qi but still double-buffered by pipeline):
        resident = 2 * (Cpad * N * 2 + Cd * N * 2)
        # Per-query-tile double-buffered blocks: shq, deep f32 tile, output.
        per_tile = 2 * (Cpad * t * 2 + 2 * Cd * t * 4)
        # Softmax slab: energy f32 + p f32 + att bf16.
        slab = t * N * (4 + 4 + 2)
        return resident + per_tile + slab

    if tq is None:
        cands = [c for c in (512, 256, 128) if c <= N and N % c == 0]
        tq = next((c for c in cands if int(vmem_need(c) * 1.25) <= vmem_cap), None)
        if tq is None:
            tq = cands[-1] if cands else N
    assert N % tq == 0
    nq = N // tq
    # TODO(synk): for very large N where even tq=128 overflows VMEM, add a kv
    # grid axis with an online softmax instead of keeping K/V fully resident.

    f32 = jnp.float32
    sh = shallow.reshape(B, Cs, N).astype(f32)
    dp32 = deep.reshape(B, Cd, N).astype(f32)

    # Hoisted, f32 algebraic fusion of the two 1x1 convs (single bf16 cast at
    # the end so the bf16 rounding chain is short).
    a_mat = wq.astype(f32).T @ wk.astype(f32)                 # (Cs, Cs) = Wq^T Wk
    r_vec = bq.astype(f32) @ wk.astype(f32)                   # (Cs,)    = bq^T Wk
    k_eff = jnp.einsum('cd,bdn->bcn', a_mat, sh)              # (B, Cs, N)
    rb = jnp.einsum('c,bcn->bn', r_vec, sh)[:, None, :]       # (B, 1, N)
    zpad = [jnp.zeros((B, pad, N), f32)] if pad else []
    keff_aug = jnp.concatenate([k_eff, rb] + zpad, axis=1).astype(jnp.bfloat16)
    sh_aug = jnp.concatenate([sh, jnp.ones((B, 1, N), f32)] + zpad,
                             axis=1).astype(jnp.bfloat16)

    deep_bf = dp32.astype(jnp.bfloat16)                       # attention operand
    gamma1 = jnp.asarray(gamma, f32).reshape(1)

    vmem_limit = int(min(vmem_cap, max(vmem_need(tq) * 1.25, 32 * 1024 * 1024)))

    out = pl.pallas_call(
        fuse_attention_kernel,
        out_shape=jax.ShapeDtypeStruct((B, Cd, N), jnp.float32),
        grid=(B, nq),
        in_specs=[
            pl.BlockSpec(memory_space=pltpu.SMEM),                               # gamma
            pl.BlockSpec((pl.Squeezed(), Cpad, tq), lambda b, qi: (b, 0, qi)),   # [sh_q;1]
            pl.BlockSpec((pl.Squeezed(), Cpad, N), lambda b, qi: (b, 0, 0)),     # [A sh;r sh]
            pl.BlockSpec((pl.Squeezed(), Cd, N), lambda b, qi: (b, 0, 0)),       # deep bf16
            pl.BlockSpec((pl.Squeezed(), Cd, tq), lambda b, qi: (b, 0, qi)),     # deep f32
        ],
        out_specs=pl.BlockSpec((pl.Squeezed(), Cd, tq), lambda b, qi: (b, 0, qi)),
        compiler_params=pltpu.CompilerParams(
            dimension_semantics=("parallel", "parallel"),
            vmem_limit_bytes=vmem_limit),
    )(gamma1, sh_aug, keff_aug, deep_bf, dp32)

    return out.reshape(B, Cd, H, W)


def fuse_attention_ref(deep, shallow, wq, bq, wk, bk, gamma):
    """Pure-JAX reference mirroring the PyTorch forward."""
    B, Cd, H, W = deep.shape
    Cs = shallow.shape[1]
    N = H * W
    sh = shallow.reshape(B, Cs, N)
    dp = deep.reshape(B, Cd, N)
    q = jnp.einsum('oc,bcn->bon', wq, sh) + bq[None, :, None]   # (B, Cq, N)
    k = jnp.einsum('oc,bcn->bon', wk, sh) + bk[None, :, None]   # (B, Cq, N)
    energy = jnp.einsum('bci,bcj->bij', q, k)                   # (B, N, N)
    att = jax.nn.softmax(energy, axis=-1)
    out = jnp.einsum('bcj,bij->bci', dp, att)                   # (B, Cd, N)
    out = gamma.reshape(()) * out + dp
    return out.reshape(B, Cd, H, W)


if __name__ == "__main__":
    # Small, module-consistent shapes: B=2, shallow_dim=8, deep_dim=4, H=W=16 (N=256).
    B, Cs, Cd, H, W = 2, 8, 4, 16, 16
    channel_reduce_rate = 4
    Cq = Cs // channel_reduce_rate

    key = jax.random.PRNGKey(0)
    k_deep, k_shal, k_wq, k_bq, k_wk, k_bk = jax.random.split(key, 6)

    deep = jax.random.normal(k_deep, (B, Cd, H, W), dtype=jnp.float32)
    shallow = jax.random.normal(k_shal, (B, Cs, H, W), dtype=jnp.float32)

    # Parameters (nn.Conv2d(Cs, Cq, 1): weight (Cq, Cs, 1, 1) -> (Cq, Cs), bias (Cq,)).
    wq = jax.random.normal(k_wq, (Cq, Cs), dtype=jnp.float32) * 0.1
    bq = jax.random.normal(k_bq, (Cq,), dtype=jnp.float32) * 0.1
    wk = jax.random.normal(k_wk, (Cq, Cs), dtype=jnp.float32) * 0.1
    bk = jax.random.normal(k_bk, (Cq,), dtype=jnp.float32) * 0.1
    # Module inits gamma to zero; use a nonzero value so the attention path is exercised.
    gamma = jnp.array([0.5], dtype=jnp.float32)

    out = fuse_attention(deep, shallow, wq, bq, wk, bk, gamma, tq=128)  # 2 query tiles
    out = jax.block_until_ready(out)

    ref = fuse_attention_ref(deep, shallow, wq, bq, wk, bk, gamma)
    assert out.shape == (B, Cd, H, W)
    err = float(jnp.max(jnp.abs(out - ref)))
    assert jnp.allclose(out, ref, rtol=1e-2, atol=1e-2), err

    print("KERNEL_OK")
</pallas_src>

<mosaic_0001>
module attributes {stable_mosaic.version = 11 : i64} {
  func.func @fuse_attention_kernel(%arg0: i32, %arg1: i32, %arg2: memref<1xf32, #tpu.memory_space<smem>>, %arg3: memref<1x16x128xbf16, #tpu.memory_space<vmem>>, %arg4: memref<1x16x256xbf16, #tpu.memory_space<vmem>>, %arg5: memref<1x4x256xbf16, #tpu.memory_space<vmem>>, %arg6: memref<1x4x128xf32, #tpu.memory_space<vmem>>, %arg7: memref<1x4x128xf32, #tpu.memory_space<vmem>>) attributes {dimension_semantics = [#tpu.dimension_semantics<parallel>, #tpu.dimension_semantics<parallel>], iteration_bounds = array<i64: 2, 2>, scalar_prefetch = 0 : i64, scratch_operands = 0 : i64, tpu.core_type = #tpu.core_type<tc>, window_params = [{transform_indices = @transform_0, window_bounds = array<i64: 1>}, {transform_indices = @transform_1, window_bounds = array<i64: 1, 16, 128>}, {transform_indices = @transform_2, window_bounds = array<i64: 1, 16, 256>}, {transform_indices = @transform_3, window_bounds = array<i64: 1, 4, 256>}, {transform_indices = @transform_4, window_bounds = array<i64: 1, 4, 128>}, {transform_indices = @transform_5, window_bounds = array<i64: 1, 4, 128>}]} {
    %c0 = arith.constant 0 : index
    %c0_0 = arith.constant 0 : index
    %c0_1 = arith.constant 0 : index
    %0 = vector.load %arg3[%c0, %c0_0, %c0_1] : memref<1x16x128xbf16, #tpu.memory_space<vmem>>, vector<1x16x128xbf16>
    %1 = vector.shape_cast %0 : vector<1x16x128xbf16> to vector<16x128xbf16>
    %c0_2 = arith.constant 0 : index
    %c0_3 = arith.constant 0 : index
    %c0_4 = arith.constant 0 : index
    %2 = vector.load %arg4[%c0_2, %c0_3, %c0_4] : memref<1x16x256xbf16, #tpu.memory_space<vmem>>, vector<1x16x256xbf16>
    %3 = vector.shape_cast %2 : vector<1x16x256xbf16> to vector<16x256xbf16>
    %cst = arith.constant dense<0.000000e+00> : vector<128x256xf32>
    %4 = tpu.matmul %1, %3, %cst {dimension_numbers = #tpu.dot_dimension_numbers<[0], [0], [1], [1], [0, 1, 1, 1], [], []>} : vector<16x128xbf16>, vector<16x256xbf16>, vector<128x256xf32> -> vector<128x256xf32>
    %cst_5 = arith.constant dense<0xFF800000> : vector<128xf32>
    %5 = vector.multi_reduction <maximumf>, %4, %cst_5 [1] : vector<128x256xf32> to vector<128xf32>
    %6 = vector.shape_cast %5 : vector<128xf32> to vector<128x1xf32>
    %7 = vector.broadcast %6 : vector<128x1xf32> to vector<128x256xf32>
    %8 = arith.subf %4, %7 : vector<128x256xf32>
    %9 = math.exp %8 : vector<128x256xf32>
    %cst_6 = arith.constant dense<0.000000e+00> : vector<128xf32>
    %10 = vector.multi_reduction <add>, %9, %cst_6 [1] : vector<128x256xf32> to vector<128xf32>
    %11 = vector.shape_cast %10 : vector<128xf32> to vector<128x1xf32>
    %cst_7 = arith.constant 1.000000e+00 : f32
    %12 = vector.broadcast %cst_7 : f32 to vector<128x1xf32>
    %13 = arith.divf %12, %11 : vector<128x1xf32>
    %14 = vector.broadcast %13 : vector<128x1xf32> to vector<128x256xf32>
    %15 = arith.mulf %9, %14 : vector<128x256xf32>
    %16 = arith.truncf %15 : vector<128x256xf32> to vector<128x256xbf16>
    %c0_8 = arith.constant 0 : index
    %c0_9 = arith.constant 0 : index
    %c0_10 = arith.constant 0 : index
    %17 = vector.load %arg5[%c0_8, %c0_9, %c0_10] : memref<1x4x256xbf16, #tpu.memory_space<vmem>>, vector<1x4x256xbf16>
    %18 = vector.shape_cast %17 : vector<1x4x256xbf16> to vector<4x256xbf16>
    %cst_11 = arith.constant dense<0.000000e+00> : vector<4x128xf32>
    %19 = tpu.matmul %18, %16, %cst_11 {dimension_numbers = #tpu.dot_dimension_numbers<[1], [1], [0], [0], [0, 0, 1, 0], [], []>} : vector<4x256xbf16>, vector<128x256xbf16>, vector<4x128xf32> -> vector<4x128xf32>
    %c0_12 = arith.constant 0 : index
    %20 = memref.load %arg2[%c0_12] : memref<1xf32, #tpu.memory_space<smem>>
    %21 = vector.broadcast %20 : f32 to vector<4x128xf32>
    %22 = arith.mulf %21, %19 : vector<4x128xf32>
    %c0_13 = arith.constant 0 : index
    %c0_14 = arith.constant 0 : index
    %c0_15 = arith.constant 0 : index
    %23 = vector.load %arg6[%c0_13, %c0_14, %c0_15] : memref<1x4x128xf32, #tpu.memory_space<vmem>>, vector<1x4x128xf32>
    %24 = vector.shape_cast %23 : vector<1x4x128xf32> to vector<4x128xf32>
    %25 = arith.addf %22, %24 : vector<4x128xf32>
    %c0_16 = arith.constant 0 : index
    %c0_17 = arith.constant 0 : index
    %c0_18 = arith.constant 0 : index
    %26 = vector.load %arg7[%c0_16, %c0_17, %c0_18] : memref<1x4x128xf32, #tpu.memory_space<vmem>>, vector<1x4x128xf32>
    %27 = vector.shape_cast %26 : vector<1x4x128xf32> to vector<4x128xf32>
    %28 = vector.shape_cast %25 : vector<4x128xf32> to vector<1x4x128xf32>
    tpu.vector_store %arg7[%c0_16, %c0_17, %c0_18], %28 {strides = array<i32>} : memref<1x4x128xf32, #tpu.memory_space<vmem>>, vector<1x4x128xf32>,
    return
  }
  func.func @transform_0(%arg0: i32, %arg1: i32) -> i32 {
    %c0_i32 = arith.constant 0 : i32
    %c0_i32_0 = arith.constant 0 : i32
    return %c0_i32 : i32
  }
  func.func @transform_1(%arg0: i32, %arg1: i32) -> (i32, i32, i32) {
    %c0_i32 = arith.constant 0 : i32
    %c0_i32_0 = arith.constant 0 : i32
    return %arg0, %c0_i32, %arg1 : i32, i32, i32
  }
  func.func @transform_2(%arg0: i32, %arg1: i32) -> (i32, i32, i32) {
    %c0_i32 = arith.constant 0 : i32
    %c0_i32_0 = arith.constant 0 : i32
    %c0_i32_1 = arith.constant 0 : i32
    return %arg0, %c0_i32, %c0_i32_0 : i32, i32, i32
  }
  func.func @transform_3(%arg0: i32, %arg1: i32) -> (i32, i32, i32) {
    %c0_i32 = arith.constant 0 : i32
    %c0_i32_0 = arith.constant 0 : i32
    %c0_i32_1 = arith.constant 0 : i32
    return %arg0, %c0_i32, %c0_i32_0 : i32, i32, i32
  }
  func.func @transform_4(%arg0: i32, %arg1: i32) -> (i32, i32, i32) {
    %c0_i32 = arith.constant 0 : i32
    %c0_i32_0 = arith.constant 0 : i32
    return %arg0, %c0_i32, %arg1 : i32, i32, i32
  }
  func.func @transform_5(%arg0: i32, %arg1: i32) -> (i32, i32, i32) {
    %c0_i32 = arith.constant 0 : i32
    %c0_i32_0 = arith.constant 0 : i32
    return %arg0, %c0_i32, %arg1 : i32, i32, i32
  }
}

</mosaic_0001>

<bundles_post_ra>
// kernel: tpu_custom_call.1
= control target key start
LH: loop header
LB: loop body
LE: loop exit
PB: predicated region body
PF: predicated region fallthrough
CT: control target
= control target key end

     0   :  { %s2161_s0 = inlined_call_operand.<no memory space> [shape: f32[1], index: 0, kind: input, shape index: {}]   ;;  %s2162_s1 = inlined_call_operand.hbm [shape: bf16[2,16,256], index: 1, kind: input, shape index: {}]   ;;  %s2163_s2 = inlined_call_operand.hbm [shape: bf16[2,16,256], index: 2, kind: input, shape index: {}]   ;;  %s2164_s3 = inlined_call_operand.vmem [shape: bf16[2,4,256], index: 3, kind: input, shape index: {}]   ;;  %s2165_s4 = inlined_call_operand.hbm [shape: f32[2,4,256], index: 4, kind: input, shape index: {}]   ;;  %s2166_s5 = inlined_call_operand.hbm [shape: f32[2,4,256], index: 5, kind: output, shape index: {}]  }
   0x1   :  { %2185 = sst [smem:[#allocation25_spill]] %s2162_s1 }
   0x2   :  { %2186 = sst [smem:[#allocation26_spill]] %s2163_s2 }
   0x3   :  { %2187 = sst [smem:[#allocation27_spill]] %s2164_s3 }
   0x4   :  { %2188 = sst [smem:[#allocation28_spill]] %s2166_s5 }
   0x5   :  { %10 = sst [smem:[#allocation2]] %s2161_s0 }
   0x6   :  { %11 = vsyncpa [#allocation4], 0 }
   0x7   :  { %13 = vsyncpa [#allocation4 + $0x1], 0 }
   0x8   :  { %14 = vsyncpa [#allocation7], 0 }
   0x9   :  { %16 = vsyncpa [#allocation7 + $0x1], 0 }
   0xa   :  { %17 = vsyncpa [#allocation5], 0 }
   0xb   :  { %19 = vsyncpa [#allocation5 + $0x1], 0  ;;  %s1542_s20 = smov 0   ;;  %s1544_s21 = smov 0  }
   0xc   :  { %s1546_s22 = smov 0   ;;  %s1548_s23 = smov 0  }
   0xd   :  { %s1550_s24 = smov 0   ;;  %s1552_s25 = smov 0  }
   0xe   :  { %s1554_s26 = smov 0   ;;  %s1556_s0 = smov 0  }
   0xf   :  { %s1558_s27 = smov 0   ;;  %s1560_s28 = smov 0  }
  0x10   :  { %s1562_s29 = smov 0  }
  0x11 LB: > { %2189 = sst [smem:[#allocation14_spill]] %s1470_s23  ;;  %s1596_s30 = sadd.s32 4294967295, %s1498_s29   ;;  %s1498_s29 = sphi %s1562_s29, %s25_s29   ;;  %s1494_s28 = sphi %s1560_s28, %s2244_s28   ;;  %s1490_s27 = sphi %s1558_s27, %s2243_s27   ;;  %s1486_s0 = sphi %s1556_s0, %s2242_s0   ;;  %s1482_s26 = sphi %s1554_s26, %s2241_s26   ;;  %s1478_s25 = sphi %s1552_s25, %s2240_s25   ;;  %s1474_s24 = sphi %s1550_s24, %s2239_s24   ;;  %s1470_s23 = sphi %s1548_s23, %s2238_s23   ;;  %s1466_s22 = sphi %s1546_s22, %s2237_s22   ;;  %s1462_s21 = sphi %s1544_s21, %s2236_s21   ;;  %s1458_s20 = sphi %s1542_s20, %s2235_s20  }
  0x12   : > { %2190 = sst [smem:[#allocation15_spill]] %s1478_s25  ;;  %s37_s6 = sadd.s32 1, %s1494_s28 }
  0x13   : > { %2191 = sst [smem:[#allocation16_spill]] %s1482_s26  ;;  %p2169_p0 = scmp.eq.s32.totalorder %s1498_s29, 0 }
  0x14   : > { %2192 = sst [smem:[#allocation17_spill]] %s1486_s0  ;;  %p2168_p1 = scmp.eq.s32.totalorder %s1596_s30, 0 }
  0x15   : > { %p100_p2 = scmp.ne.s32.totalorder %s1466_s22, %s1462_s21  ;;  %p106_p3 = scmp.ne.s32.totalorder %s1462_s21, %s1458_s20 }
  0x16   : > { %p2167_p7 = scmp.lt.s32.totalorder %s1498_s29, 4  ;;  %s237_s9 = sand.u32 1, %s1498_s29  }
  0x17   : > { %p102_p5 = por %p100_p2, %p2169_p0  ;;  %p1610_p6 = por %p106_p3, %p2168_p1 }
  0x18   : > { %s239_s10 = sand.u32 1, %s1466_s22   ;;  %s1059_s12 = sshll.u32 %s1494_s28, 8 }
  0x19   : > { %s2193_s8 = scalar_select %p1610_p6, 1, 0 }
  0x1a   : > { %s1029_s11 = sshll.u32 %s239_s10, 4  ;;  %s2195_s2 = sld [smem:[#allocation26_spill]] }
  0x1b   : > { %2194 = sst [smem:[#allocation18_spill]] %s2193_s8  ;;  %s241_s16 = scalar_lea.vmem [#allocation6], %s1029_s11 }
  0x1c   : > { %s248_s17 = sshll.u32 %s241_s16, 4  ;;  %p1625_p8 = pnand %p2167_p7, %p102_p5  ;;  %s1629_s17 = int_to_ptr.vmem [resolvable:$true] %s248_s17 }
  0x1d   : > { %s1632_s19 = scalar_lea.sflag [#allocation7], %s237_s9 }
  0x1e   : > { %p1280_p11 = pneg %p1625_p8 }
  0x20   : > { %s1621_s15 = scalar_lea.hbm %s2195_s2, %s1059_s12  ;;  %s1283_s12 = scalar_lea.hbm %s2195_s2, 512 }
  0x21   : > { %s1278_s20 = scalar_lea.hbm %s1621_s15, 256  ;;  %p1284_p2 = scmp.lt.u32.totalorder %s1621_s15, %s2195_s2 }
  0x22   : > { %p1279_p10 = scmp.ne.s32.totalorder %s1621_s15, %s1278_s20  ;;  %p1285_p3 = scmp.lt.u32.totalorder %s1283_s12, %s1278_s20 }
  0x23   : > { %p1287_p7 = scmp.lt.u32.totalorder %s1278_s20, %s1621_s15 }
  0x24   : > { %p1281_p12 = pnand %p1280_p11, %p1279_p10  ;;  %p1286_p5 = por %p1285_p3, %p1284_p2 }
  0x26   : > { %p1282_p13 = pneg %p1281_p12  ;;  %p1288_p4 = por %p1287_p7, %p1286_p5 }
  0x28   : > { %p1289_p1 = pnand %p1288_p4, %p1282_p13 }
  0x2a   : > { %1292 = shalt.err (!%p1289_p1)
}
  0x2b   : > { %s1293_s9 = scalar_lea.vmem %s1629_s17, 256  ;;  %s1500_s16 = smov [#allocation6]  }
  0x2c   : > { %p1294_p10 = scmp.ne.s32.totalorder %s1629_s17, %s1293_s9  ;;  %s1298_s10 = sshll.u32 %s1500_s16, 4  ;;  %s1299_s10 = int_to_ptr.vmem [resolvable:$false] %s1298_s10 }
  0x2d   : > { %s1300_s11 = scalar_lea.vmem %s1299_s10, 512  ;;  %p1301_p9 = scmp.lt.s32.totalorder %s1629_s17, %s1299_s10 }
  0x2e   : > { %p1296_p12 = pnand %p1294_p10, %p1280_p11  ;;  %p1302_p2 = scmp.lt.s32.totalorder %s1300_s11, %s1293_s9 }
  0x30   : > { %p1297_p0 = pneg %p1296_p12  ;;  %p1303_p3 = por %p1302_p2, %p1301_p9 }
  0x32   : > { %p1304_p7 = pnand %p1303_p3, %p1297_p0 }
  0x34   : > { %1307 = shalt.err (!%p1304_p7)
}
  0x35   : > { %s2170_s20 = smov 128   ;;  %s1502_s12 = smov 8  }
  0x36   : > { %1075 = dma.hbm_to_vmem [thread:$0]  (!%p1625_p8), %s1621_s15, 256, %s1629_s17, %s1632_s19, %s2170_s20, %s2170_s20, %s1502_s12  }
  0x37   : > { %p284_p0 = scmp.lt.s32.totalorder %s1498_s29, 5  ;;  %p2197_p1 = scmp.ge.s32.totalorder %s1498_s29, 1 }
  0x38   : > { %s1023_s14 = sadd.s32 4294967294, %s1498_s29   ;;  %s34_s9 = sadd.s32 1, %s1490_s27 }
  0x39   : > { %p1665_p4 = pnand %p2197_p1, %p284_p0  ;;  %p35_p9 = scmp.ge.s32.totalorder %s34_s9, 2 }
  0x3a   : > { %s67_s16 = sadd.s32 1, %s1478_s25  ;;  %p74_p11 = scmp.ne.s32.totalorder %s1478_s25, %s1474_s24 }
  0x3b   : > { %s2198_s13 = scalar_select %p1665_p4, 1, 0 }
  0x3c   : > { %p80_p13 = scmp.ne.s32.totalorder %s1474_s24, %s1470_s23  ;;  %s2246_s9 = smov (%p35_p9, %s34_s9), 0 }
  0x3d   : > { %2199 = sst [smem:[#allocation19_spill]] %s2246_s9  ;;  %s2248_s6 = smov (!%p35_p9, %s37_s6), %s1494_s28 }
  0x3e   : > { %s63_s15 = ssub.s32 %s1490_s27, %s2246_s9  ;;  %p2200_p8 = scmp.eq.s32.totalorder %s1498_s29, 0 }
  0x3f   : > { %p39_p10 = scmp.ge.s32.totalorder %s2248_s6, 2  ;;  %p2202_p12 = scmp.eq.s32.totalorder %s1596_s30, 0 }
  0x40   : > { %p1685_p5 = por %p2200_p8, %p74_p11  ;;  %p2204_p3 = scmp.eq.s32.totalorder %s1596_s30, 3 }
  0x41   : > { %p1691_p2 = por %p2202_p12, %p80_p13  ;;  %p192_p0 = scmp.eq.s32.totalorder %s1023_s14, 3 }
  0x42   : > { %p1697_p7 = por %p2204_p3, %p74_p11  ;;  %s2250_s6 = smov (%p39_p10, %s2248_s6), 0 }
  0x43   : > { %s2203_s18 = scalar_select %p1691_p2, 1, 0 }
  0x44   : > { %s2205_s10 = scalar_select %p1697_p7, 1, 0 }
  0x45   : > { %2207 = sst [smem:[#allocation21_spill]] %s2250_s6  ;;  %p1703_p1 = por %p192_p0, %p80_p13 }
  0x46   : > { %2206 = sst [smem:[#allocation20_spill]] %s2205_s10  ;;  %s1708_s12 = sand.u32 1, %s1478_s25  }
  0x47   : > { %s2208_s11 = scalar_select %p1703_p1, 1, 0 }
  0x48   : > { %s62_s20 = ssub.s32 %s1494_s28, %s2250_s6  ;;  %s1026_s2 = sshll.u32 %s1708_s12, 3 }
  0x49   : > { %2209 = sst [smem:[#allocation22_spill]] %s2208_s11  ;;  %s64_s7 = sor.u32 %s63_s15, %s62_s20 }
  0x4a   : > { %p91_p9 = scmp.eq.s32.totalorder %s62_s20, 0  ;;  %p65_p11 = scmp.eq.s32.totalorder %s64_s7, 0 }
  0x4b   : > { %s2210_s14 = sadd.s32 1, %s1466_s22  ;;  %s1027_s5 = sshll.u32 %s1494_s28, 2 }
  0x4c   : > { %s1716_s9 = scalar_select %p91_p9, %s1466_s22, %s2210_s14  }
  0x4d   : > { %s1719_s23 = scalar_select %p65_p11, %s1478_s25, %s67_s16  }
  0x4e   : > { %2211 = sst [smem:[#allocation23_spill]] %s1716_s9  ;;  %s224_s10 = sadd.s32 %s1490_s27, %s1027_s5 }
  0x4f   : > { %2212 = sst [smem:[#allocation24_spill]] %s1719_s23  ;;  %s219_s11 = scalar_lea.vmem [#allocation3], %s1026_s2 }
  0x50   : > { %s227_s26 = sshll.u32 %s219_s11, 4  ;;  %s1028_s3 = sshll.u32 %s224_s10, 6  ;;  %s1723_s26 = int_to_ptr.vmem [resolvable:$true] %s227_s26 }
  0x51   : > { %s2213_s1 = sld [smem:[#allocation25_spill]]  ;;  %p2214_p13 = scmp.lt.s32.totalorder %s1498_s29, 4 }
  0x52   : > { %s1032_s2 = sshll.u32 %s1708_s12, 2  ;;  %s216_s5 = scalar_lea.sflag [#allocation4], %s1708_s12 }
  0x53   : > { %p1734_p8 = pnand %p2214_p13, %p1685_p5 }
  0x55   : > { %p1310_p12 = pneg %p1734_p8 }
  0x57   : > { %s1728_s6 = scalar_lea.hbm %s2213_s1, %s1028_s3  ;;  %s1313_s8 = scalar_lea.hbm %s2213_s1, 512 }
  0x58   : > { %s1308_s20 = scalar_lea.hbm %s1728_s6, 128  ;;  %p1314_p5 = scmp.lt.u32.totalorder %s1728_s6, %s2213_s1 }
  0x59   : > { %p1309_p10 = scmp.ne.s32.totalorder %s1728_s6, %s1308_s20  ;;  %p1315_p9 = scmp.lt.u32.totalorder %s1313_s8, %s1308_s20 }
  0x5a   : > { %p1317_p13 = scmp.lt.u32.totalorder %s1308_s20, %s1728_s6 }
  0x5b   : > { %p1311_p3 = pnand %p1310_p12, %p1309_p10  ;;  %p1316_p11 = por %p1315_p9, %p1314_p5 }
  0x5d   : > { %p1312_p0 = pneg %p1311_p3  ;;  %p1318_p1 = por %p1317_p13, %p1316_p11 }
  0x5f   : > { %p1319_p7 = pnand %p1318_p1, %p1312_p0 }
  0x61   : > { %1322 = shalt.err (!%p1319_p7)
}
  0x62   : > { %s1323_s17 = scalar_lea.vmem %s1723_s26, 128  ;;  %s1503_s10 = smov [#allocation3]  }
  0x63   : > { %p1324_p10 = scmp.ne.s32.totalorder %s1723_s26, %s1323_s17  ;;  %s1328_s11 = sshll.u32 %s1503_s10, 4  ;;  %s1329_s11 = int_to_ptr.vmem [resolvable:$false] %s1328_s11 }
  0x64   : > { %s1330_s14 = scalar_lea.vmem %s1329_s11, 256  ;;  %p1331_p2 = scmp.lt.s32.totalorder %s1723_s26, %s1329_s11 }
  0x65   : > { %p1326_p3 = pnand %p1324_p10, %p1310_p12  ;;  %p1332_p5 = scmp.lt.s32.totalorder %s1330_s14, %s1323_s17 }
  0x67   : > { %p1327_p6 = pneg %p1326_p3  ;;  %p1333_p9 = por %p1332_p5, %p1331_p2 }
  0x69   : > { %p1334_p11 = pnand %p1333_p9, %p1327_p6 }
  0x6b   : > { %1337 = shalt.err (!%p1334_p11)
}
  0x6c   : > { %s1504_s20 = smov 64   ;;  %s1505_s3 = smov 4  }
  0x6d   : > { %s2216_s0 = smov 128   ;;  %s1033_s8 = sshll.u32 %s1494_s28, 1 }
  0x6e   : > { %1072 = dma.hbm_to_vmem [thread:$0]  (!%p1734_p8), %s1728_s6, 128, %s1723_s26, %s216_s5, %s2216_s0, %s1504_s20, %s1505_s3  }
  0x6f   : > { %s275_s16 = sadd.s32 %s1490_s27, %s1033_s8  ;;  %s270_s15 = scalar_lea.vmem [#allocation8], %s1032_s2 }
  0x70   : > { %s279_s17 = sshll.u32 %s270_s15, 4  ;;  %s1034_s10 = sshll.u32 %s275_s16, 6  ;;  %s280_s17 = int_to_ptr.vmem [resolvable:$true] %s279_s17 }
  0x71   : > { %s277_s1 = scalar_lea.hbm %s2165_s4, %s1034_s10  ;;  %s1343_s26 = scalar_lea.hbm %s2165_s4, 256 }
  0x72   : > { %s1338_s23 = scalar_lea.hbm %s277_s1, 64  ;;  %p1344_p1 = scmp.lt.u32.totalorder %s277_s1, %s2165_s4 }
  0x73   : > { %p1339_p6 = scmp.ne.s32.totalorder %s277_s1, %s1338_s23  ;;  %p1345_p0 = scmp.lt.u32.totalorder %s1343_s26, %s1338_s23 }
  0x74   : > { %p1347_p10 = scmp.lt.u32.totalorder %s1338_s23, %s277_s1 }
  0x75   : > { %p1341_p2 = pnand %p1339_p6, %p1310_p12  ;;  %p1346_p13 = por %p1345_p0, %p1344_p1 }
  0x77   : > { %p1342_p7 = pneg %p1341_p2  ;;  %p1348_p3 = por %p1347_p10, %p1346_p13 }
  0x79   : > { %p1349_p5 = pnand %p1348_p3, %p1342_p7 }
  0x7b   : > { %1352 = shalt.err (!%p1349_p5)
}
  0x7c   : > { %s1353_s2 = scalar_lea.vmem %s280_s17, 64  ;;  %s1506_s5 = smov [#allocation8]  }
  0x7d   : > { %p1354_p9 = scmp.ne.s32.totalorder %s280_s17, %s1353_s2  ;;  %s1358_s25 = sshll.u32 %s1506_s5, 4  ;;  %s1359_s25 = int_to_ptr.vmem [resolvable:$false] %s1358_s25 }
  0x7e   : > { %s1360_s9 = scalar_lea.vmem %s1359_s25, 128  ;;  %p1361_p2 = scmp.lt.s32.totalorder %s280_s17, %s1359_s25 }
  0x7f   : > { %p1356_p11 = pnand %p1354_p9, %p1310_p12  ;;  %p1362_p4 = scmp.lt.s32.totalorder %s1360_s9, %s1353_s2 }
  0x81   : > { %p1357_p6 = pneg %p1356_p11  ;;  %p1363_p0 = por %p1362_p4, %p1361_p2 }
  0x83   : > { %p1364_p1 = pnand %p1363_p0, %p1357_p6 }
  0x85   : > { %1367 = shalt.err (!%p1364_p1)
}
  0x86   : > { %1078 = dma.hbm_to_vmem [thread:$0]  (!%p1734_p8), %s277_s1, 64, %s280_s17, %s1632_s19  }
  0x87   : > { %p2217_p7 = scmp.ne.s32.totalorder %s2198_s13, 0 }
  0x88   : > { %s1793_s23 = sand.u32 (!%p2217_p7), 1, %s1474_s24   ;;  %p2218_p12 = scmp.ne.s32.totalorder (!%p2217_p7), %s2203_s18, 0 }
  0x89   : > { %288 = sbr.rel (%p2217_p7) target bundleno = 1091 (0x443), region = 40  ;;  %s1036_s20 = sshll.u32 (!%p2217_p7), %s1793_s23, 3 }
  0x8a   : > { %s291_s3 = scalar_lea.sflag (!%p2217_p7), [#allocation4], %s1793_s23  ;;  %s294_s0 = scalar_lea.vmem (!%p2217_p7), [#allocation3], %s1036_s20 }
  0x90   : > { %1441 = dma.done.wait (%p2218_p12), %s291_s3, 128  }
  0x91   : > { %1443 = vsyncadd (%p2218_p12), %s291_s3, 4294967168  ;;  %s2219_s1 = sld [smem:[#allocation18_spill]]  ;;  %s299_s19 = sand.u32 1, %s1596_s30  }
  0x92   : > { %s301_s13 = sand.u32 1, %s1462_s21   ;;  %s300_s8 = scalar_lea.sflag [#allocation7], %s299_s19 }
  0x93   : > { %s1037_s7 = sshll.u32 %s301_s13, 4 }
  0x94   : > { %s303_s16 = scalar_lea.vmem [#allocation6], %s1037_s7 }
  0x97   : > { %p2220_p4 = scmp.ne.s32.totalorder %s2219_s1, 0 }
  0x99   : > { %1445 = dma.done.wait (%p2220_p4), %s300_s8, 256  }
  0x9a   : > { %1447 = vsyncadd (%p2220_p4), %s300_s8, 4294967040  ;;  %s1038_s15 = sshll.u32 %s1793_s23, 2 }
  0x9b   : > { %s1810_s17 = scalar_lea.vmem [#allocation8], %s1038_s15 }
  0x9c   : > { %1449 = dma.done.wait (%p2218_p12), %s300_s8, 64  }
  0x9d   : > { %1451 = vsyncadd (%p2218_p12), %s300_s8, 4294967232  ;;  %v1507_v0 = vmov 0   ;;  %v1178_v1 = vld [vmem:[%s294_s0] sm:$0xff]   ;;  %vm396_vm0 = vcmask 130048   ;;  %s2221_s30 = sld [smem:[#allocation17_spill]]  ;;  %s2222_s26 = sld [smem:[#allocation27_spill]] }
  0x9e   : > { %453 = vmatprep.mubr.bf16.mxu0 %v1507_v0  ;;  %v1179_v2 = vld [vmem:[%s303_s16 + $0x4] ss:$8 sps:$4 sm:$0xff]   ;;  %370 = vxpose.xlu0.c.b16.start.end [1/1] (short) %v1178_v1, 128  ;;  %v1181_v3 = vld [vmem:[%s303_s16] ss:$8 sps:$4 sm:$0xff]   ;;  %s2223_s12 = sld [smem:[#allocation16_spill]]  ;;  %s858_s2 = sld [smem:[#allocation2]] }
  0x9f   : > { %421 = vmatprep.subr.bf16.mxu0 %v1179_v2  ;;  %s2224_s9 = sld [smem:[#allocation20_spill]]  ;;  %s353_s3 = scalar_lea.vmem [#allocation9], %s1038_s15 }
  0xa0   : > { %422 = vmatpush1.bf16.msra.mxu0 %v1181_v3  ;;  %s880_s0 = sshll.u32 %s353_s3, 4  ;;  %s2225_s13 = sld [smem:[#allocation28_spill]]  ;;  %s2100_s0 = int_to_ptr.vmem [resolvable:$true] %s880_s0 }
  0xa1   : > { %s865_s8 = scalar_lea.sflag [#allocation5], %s1793_s23  ;;  %s1368_s16 = scalar_lea.vmem %s2100_s0, 64 }
  0xa2   : > { %p1369_p13 = scmp.ne.s32.totalorder %s2100_s0, %s1368_s16  ;;  %s1508_s15 = smov [#allocation9]  }
  0xa3   : > { %p354_p8 = scmp.lt.s32.totalorder %s2221_s30, 1  ;;  %s1055_s5 = sshll.u32 %s2221_s30, 1 }
  0xa4   : > { %s876_s25 = sadd.s32 %s2223_s12, %s1055_s5 }
  0xa5   : > { %s355_s18 = scalar_select %p354_p8, %s2221_s30, 1 }
  0xa6   : > { %s1056_s20 = sshll.u32 %s876_s25, 6  ;;  %p2226_p10 = scmp.ne.s32.totalorder %s2224_s9, 0 }
  0xa7   : > { %s1060_s10 = sshll.u32 %s355_s18, 2  ;;  %s2098_s7 = scalar_lea.hbm %s2225_s13, %s1056_s20 }
  0xa8   : > { %s358_s6 = scalar_lea.vmem %s2222_s26, %s1060_s10  ;;  %p1370_p3 = pnand %p1369_p13, %p2226_p10 }
  0xaa   : > { %p1371_p5 = pneg %p1370_p3 }
 0x104   : > { %v378_v4 = vpop.trf.xlu0 }
 0x105   : > { %1045 = vmatmul.mubr.msk.bf16.vlgmr.msra.gmra.mrb[0].mxu0 %vm396_vm0, %v378_v4 }
 0x106   : > { %463 = vmatprep.mubr.bf16.mxu0 %v1507_v0 }
 0x108   : > { %v379_v5 = vpop.trf.xlu0 }
 0x10c   : > { %v380_v6 = vpop.trf.xlu0 }
 0x10d   : > { %1046 = vmatmul.mubr.msk.bf16.gmra.mrb[4].mxu0 %vm396_vm0, %v379_v5 }
 0x10e   : > { %473 = vmatprep.mubr.bf16.mxu0 %v1507_v0 }
 0x110   : > { %v381_v7 = vpop.trf.xlu0 }
 0x114   : > { %v382_v8 = vpop.trf.xlu0 }
 0x115   : > { %1047 = vmatmul.mubr.msk.bf16.gmra.mrb[8].mxu0 %vm396_vm0, %v380_v6 }
 0x116   : > { %483 = vmatprep.mubr.bf16.mxu0 %v1507_v0 }
 0x118   : > { %v383_v9 = vpop.trf.xlu0 }
 0x11c   : > { %v384_v10 = vpop.trf.xlu0 }
 0x11d   : > { %1048 = vmatmul.mubr.msk.bf16.gmra.mrb[12].mxu0 %vm396_vm0, %v381_v7 }
 0x11e   : > { %493 = vmatprep.mubr.bf16.mxu0 %v1507_v0 }
 0x120   : > { %v385_v11 = vpop.trf.xlu0 }
 0x125   : > { %1049 = vmatmul.mubr.msk.bf16.gmra.mrb[16].mxu0 %vm396_vm0, %v382_v8 }
 0x126   : > { %503 = vmatprep.mubr.bf16.mxu0 %v1507_v0 }
 0x12d   : > { %1050 = vmatmul.mubr.msk.bf16.gmra.mrb[20].mxu0 %vm396_vm0, %v383_v9 }
 0x12e   : > { %513 = vmatprep.mubr.bf16.mxu0 %v1507_v0 }
 0x135   : > { %1051 = vmatmul.mubr.msk.bf16.gmra.mrb[24].mxu0 %vm396_vm0, %v384_v10 }
 0x136   : > { %523 = vmatprep.mubr.bf16.mxu0 %v1507_v0 }
 0x13d   : > { %1052 = vmatmul.mubr.msk.bf16.gmra.mrb[28].mxu0 %vm396_vm0, %v385_v11 }
 0x1d8   : > { %v1824_v12 = vpop.f32.mrb[0].mxu0 }
 0x1d9   : > { %v1826_v13 = vpop.f32.mrb[1].mxu0 }
 0x1da   : > { %v1828_v14 = vpop.f32.mrb[2].mxu0  ;;  %v534_v15 = vmax.f32 %v1824_v12, %v1826_v13 }
 0x1db   : > { %v1832_v16 = vpop.f32.mrb[3].mxu0 }
 0x1dc   : > { %535 = vmax.xlane.f32.xlu0 %v534_v15  ;;  %v537_v17 = vmax.f32 %v1828_v14, %v1832_v16 }
 0x1de   : > { %538 = vmax.xlane.f32.xlu1 %v537_v17 }
 0x1e0   : > { %v1836_v18 = vpop.f32.mrb[4].mxu0 }
 0x1e1   : > { %v1838_v19 = vpop.f32.mrb[5].mxu0 }
 0x1e2   : > { %v1840_v20 = vpop.f32.mrb[6].mxu0  ;;  %v540_v21 = vmax.f32 %v1836_v18, %v1838_v19 }
 0x1e3   : > { %v1844_v22 = vpop.f32.mrb[7].mxu0 }
 0x1e4   : > { %541 = vmax.xlane.f32.xlu1 %v540_v21  ;;  %v543_v23 = vmax.f32 %v1840_v20, %v1844_v22 }
 0x1e8   : > { %544 = vmax.xlane.f32.xlu1 %v543_v23  ;;  %v1848_v24 = vpop.f32.mrb[8].mxu0 }
 0x1e9   : > { %v1850_v25 = vpop.f32.mrb[9].mxu0 }
 0x1ea   : > { %v1852_v26 = vpop.f32.mrb[10].mxu0  ;;  %v546_v27 = vmax.f32 %v1848_v24, %v1850_v25 }
 0x1eb   : > { %v1856_v28 = vpop.f32.mrb[11].mxu0 }
 0x1ec   : > { %547 = vmax.xlane.f32.xlu1 %v546_v27  ;;  %v549_v29 = vmax.f32 %v1852_v26, %v1856_v28 }
 0x1f0   : > { %550 = vmax.xlane.f32.xlu1 %v549_v29  ;;  %v1860_v30 = vpop.f32.mrb[12].mxu0 }
 0x1f1   : > { %v1862_v31 = vpop.f32.mrb[13].mxu0 }
 0x1f2   : > { %v1864_v32 = vpop.f32.mrb[14].mxu0  ;;  %v552_v33 = vmax.f32 %v1860_v30, %v1862_v31 }
 0x1f3   : > { %v1868_v34 = vpop.f32.mrb[15].mxu0 }
 0x1f4   : > { %553 = vmax.xlane.f32.xlu1 %v552_v33  ;;  %v555_v35 = vmax.f32 %v1864_v32, %v1868_v34 }
 0x1f8   : > { %556 = vmax.xlane.f32.xlu1 %v555_v35  ;;  %v1872_v36 = vpop.f32.mrb[16].mxu0 }
 0x1f9   : > { %v1874_v37 = vpop.f32.mrb[17].mxu0 }
 0x1fa   : > { %v1876_v38 = vpop.f32.mrb[18].mxu0  ;;  %v558_v39 = vmax.f32 %v1872_v36, %v1874_v37 }
 0x1fb   : > { %v1880_v40 = vpop.f32.mrb[19].mxu0 }
 0x1fc   : > { %559 = vmax.xlane.f32.xlu1 %v558_v39  ;;  %v561_v41 = vmax.f32 %v1876_v38, %v1880_v40 }
 0x200   : > { %562 = vmax.xlane.f32.xlu1 %v561_v41  ;;  %v1884_v42 = vpop.f32.mrb[20].mxu0 }
 0x201   : > { %v1886_v43 = vpop.f32.mrb[21].mxu0 }
 0x202   : > { %v1888_v44 = vpop.f32.mrb[22].mxu0  ;;  %v564_v45 = vmax.f32 %v1884_v42, %v1886_v43 }
 0x203   : > { %v1892_v46 = vpop.f32.mrb[23].mxu0 }
 0x204   : > { %565 = vmax.xlane.f32.xlu1 %v564_v45  ;;  %v567_v47 = vmax.f32 %v1888_v44, %v1892_v46 }
 0x208   : > { %568 = vmax.xlane.f32.xlu1 %v567_v47  ;;  %v1896_v48 = vpop.f32.mrb[24].mxu0 }
 0x209   : > { %v1898_v49 = vpop.f32.mrb[25].mxu0 }
 0x20a   : > { %v1900_v50 = vpop.f32.mrb[26].mxu0  ;;  %v570_v51 = vmax.f32 %v1896_v48, %v1898_v49 }
 0x20b   : > { %v1904_v52 = vpop.f32.mrb[27].mxu0 }
 0x20c   : > { %571 = vmax.xlane.f32.xlu1 %v570_v51  ;;  %v573_v53 = vmax.f32 %v1900_v50, %v1904_v52 }
 0x20e   : > { %574 = vmax.xlane.f32.xlu0 %v573_v53 }
 0x210   : > { %v1908_v54 = vpop.f32.mrb[28].mxu0 }
 0x211   : > { %v1910_v55 = vpop.f32.mrb[29].mxu0 }
 0x212   : > { %v1912_v56 = vpop.f32.mrb[30].mxu0  ;;  %v576_v57 = vmax.f32 %v1908_v54, %v1910_v55 }
 0x213   : > { %v1916_v58 = vpop.f32.mrb[31].mxu0 }
 0x214   : > { %v579_v59 = vmax.f32 %v1912_v56, %v1916_v58  ;;  %577 = vmax.xlane.f32.xlu1 %v576_v57 }
 0x216   : > { %580 = vmax.xlane.f32.xlu0 %v579_v59 }
 0x269   : > { %v536_v60 = vpop.xlane.xlu0 %535 }
 0x26a   : > { %v582_v61 = vsub.f32 %v1824_v12, %v536_v60  ;;  %v583_v62 = vsub.f32 %v1826_v13, %v536_v60 }
 0x26b   : > { %v539_v63 = vpop.xlane.xlu1 %538 }
 0x26c   : > { %v614_v0 = vmul.f32 1.442695, %v582_v61  ;;  %v616_v1 = vmul.f32 1.442695, %v583_v62  ;;  %v584_v2 = vsub.f32 %v1828_v14, %v539_v63  ;;  %v585_v3 = vsub.f32 %v1832_v16, %v539_v63 }
 0x26e   : > { %1182 = vpow2.f32 %v614_v0  ;;  %v618_v4 = vmul.f32 1.442695, %v584_v2  ;;  %v620_v5 = vmul.f32 1.442695, %v585_v3 }
 0x26f   : > { %1184 = vpow2.f32 %v616_v1 }
 0x270   : > { %1186 = vpow2.f32 %v618_v4 }
 0x271   : > { %1188 = vpow2.f32 %v620_v5  ;;  %v542_v6 = vpop.xlane.xlu1 %541 }
 0x272   : > { %v586_v7 = vsub.f32 %v1836_v18, %v542_v6  ;;  %v587_v8 = vsub.f32 %v1838_v19, %v542_v6 }
 0x274   : > { %v622_v9 = vmul.f32 1.442695, %v586_v7  ;;  %v624_v10 = vmul.f32 1.442695, %v587_v8 }
 0x275   : > { %v545_v11 = vpop.xlane.xlu1 %544 }
 0x276   : > { %1190 = vpow2.f32 %v622_v9  ;;  %v588_v12 = vsub.f32 %v1840_v20, %v545_v11  ;;  %v589_v13 = vsub.f32 %v1844_v22, %v545_v11 }
 0x277   : > { %1192 = vpow2.f32 %v624_v10 }
 0x278   : > { %v1928_v14 = vpop.eup %1182  ;;  %v626_v15 = vmul.f32 1.442695, %v588_v12  ;;  %v628_v16 = vmul.f32 1.442695, %v589_v13 }
 0x279   : > { %v1930_v17 = vpop.eup %1184  ;;  %v548_v21 = vpop.xlane.xlu1 %547 }
 0x27a   : > { %v1932_v23 = vpop.eup %1186  ;;  %1194 = vpow2.f32 %v626_v15  ;;  %v590_v18 = vsub.f32 %v1848_v24, %v548_v21  ;;  %v591_v19 = vsub.f32 %v1850_v25, %v548_v21  ;;  %v678_v20 = vadd.f32 %v1930_v17, %v1928_v14 }
 0x27b   : > { %v1938_v27 = vpop.eup %1188  ;;  %1196 = vpow2.f32 %v628_v16 }
 0x27c   : > { %v630_v22 = vmul.f32 1.442695, %v590_v18  ;;  %v632_v29 = vmul.f32 1.442695, %v591_v19  ;;  %679 = vadd.xlane.f32.xlu1 %v678_v20  ;;  %v681_v33 = vadd.f32 %v1938_v27, %v1932_v23 }
 0x27d   : > { %v551_v35 = vpop.xlane.xlu1 %550 }
 0x27e   : > { %1198 = vpow2.f32 %v630_v22  ;;  %v592_v39 = vsub.f32 %v1852_v26, %v551_v35  ;;  %v593_v24 = vsub.f32 %v1856_v28, %v551_v35  ;;  %682 = vadd.xlane.f32.xlu0 %v681_v33 }
 0x27f   : > { %1200 = vpow2.f32 %v632_v29 }
 0x280   : > { %v1944_v25 = vpop.eup %1190  ;;  %v634_v41 = vmul.f32 1.442695, %v592_v39  ;;  %v636_v45 = vmul.f32 1.442695, %v593_v24 }
 0x281   : > { %v1946_v47 = vpop.eup %1192  ;;  %v554_v51 = vpop.xlane.xlu1 %553 }
 0x282   : > { %1202 = vpow2.f32 %v634_v41  ;;  %v594_v53 = vsub.f32 %v1860_v30, %v554_v51  ;;  %v595_v57 = vsub.f32 %v1862_v31, %v554_v51  ;;  %v684_v59 = vadd.f32 %v1946_v47, %v1944_v25 }
 0x283   : > { %1204 = vpow2.f32 %v636_v45 }
 0x284   : > { %v1952_v26 = vpop.eup %1194  ;;  %v638_v28 = vmul.f32 1.442695, %v594_v53  ;;  %v640_v60 = vmul.f32 1.442695, %v595_v57  ;;  %685 = vadd.xlane.f32.xlu1 %v684_v59 }
 0x285   : > { %v1954_v61 = vpop.eup %1196  ;;  %v557_v62 = vpop.xlane.xlu1 %556 }
 0x286   : > { %1206 = vpow2.f32 %v638_v28  ;;  %v596_v63 = vsub.f32 %v1864_v32, %v557_v62  ;;  %v597_v0 = vsub.f32 %v1868_v34, %v557_v62  ;;  %v687_v30 = vadd.f32 %v1954_v61, %v1952_v26 }
 0x287   : > { %1208 = vpow2.f32 %v640_v60 }
 0x288   : > { %v1960_v31 = vpop.eup %1198  ;;  %v642_v1 = vmul.f32 1.442695, %v596_v63  ;;  %v644_v2 = vmul.f32 1.442695, %v597_v0  ;;  %688 = vadd.xlane.f32.xlu0 %v687_v30 }
 0x289   : > { %v1962_v3 = vpop.eup %1200  ;;  %v560_v4 = vpop.xlane.xlu1 %559 }
 0x28a   : > { %1210 = vpow2.f32 %v642_v1  ;;  %v598_v5 = vsub.f32 %v1872_v36, %v560_v4  ;;  %v599_v6 = vsub.f32 %v1874_v37, %v560_v4  ;;  %v690_v32 = vadd.f32 %v1962_v3, %v1960_v31 }
 0x28b   : > { %1212 = vpow2.f32 %v644_v2 }
 0x28c   : > { %v1968_v34 = vpop.eup %1202  ;;  %v646_v7 = vmul.f32 1.442695, %v598_v5  ;;  %v648_v8 = vmul.f32 1.442695, %v599_v6  ;;  %691 = vadd.xlane.f32.xlu1 %v690_v32 }
 0x28d   : > { %v1970_v9 = vpop.eup %1204  ;;  %v563_v10 = vpop.xlane.xlu1 %562 }
 0x28e   : > { %1214 = vpow2.f32 %v646_v7  ;;  %v600_v11 = vsub.f32 %v1876_v38, %v563_v10  ;;  %v601_v12 = vsub.f32 %v1880_v40, %v563_v10  ;;  %v693_v36 = vadd.f32 %v1970_v9, %v1968_v34 }
 0x28f   : > { %1216 = vpow2.f32 %v648_v8 }
 0x290   : > { %v1976_v37 = vpop.eup %1206  ;;  %v650_v13 = vmul.f32 1.442695, %v600_v11  ;;  %v652_v15 = vmul.f32 1.442695, %v601_v12  ;;  %694 = vadd.xlane.f32.xlu0 %v693_v36 }
 0x291   : > { %v1978_v16 = vpop.eup %1208  ;;  %v566_v21 = vpop.xlane.xlu1 %565 }
 0x292   : > { %1218 = vpow2.f32 %v650_v13  ;;  %v602_v18 = vsub.f32 %v1884_v42, %v566_v21  ;;  %v603_v19 = vsub.f32 %v1886_v43, %v566_v21  ;;  %v696_v38 = vadd.f32 %v1978_v16, %v1976_v37 }
 0x293   : > { %1220 = vpow2.f32 %v652_v15 }
 0x294   : > { %v1984_v40 = vpop.eup %1210  ;;  %v654_v20 = vmul.f32 1.442695, %v602_v18  ;;  %v656_v22 = vmul.f32 1.442695, %v603_v19  ;;  %697 = vadd.xlane.f32.xlu1 %v696_v38 }
 0x295   : > { %v1986_v29 = vpop.eup %1212  ;;  %v569_v33 = vpop.xlane.xlu1 %568 }
 0x296   : > { %1222 = vpow2.f32 %v654_v20  ;;  %v604_v35 = vsub.f32 %v1888_v44, %v569_v33  ;;  %v605_v39 = vsub.f32 %v1892_v46, %v569_v33  ;;  %v699_v42 = vadd.f32 %v1986_v29, %v1984_v40 }
 0x297   : > { %1224 = vpow2.f32 %v656_v22 }
 0x298   : > { %v1992_v43 = vpop.eup %1214  ;;  %v658_v24 = vmul.f32 1.442695, %v604_v35  ;;  %v660_v41 = vmul.f32 1.442695, %v605_v39  ;;  %700 = vadd.xlane.f32.xlu0 %v699_v42 }
 0x299   : > { %v1994_v45 = vpop.eup %1216  ;;  %v572_v51 = vpop.xlane.xlu1 %571  ;;  %v2053_v39 = vld.sshfl [vmem:[%s358_s6] sm:$0x33 pattern:$0x76325410] }
 0x29a   : > { %1226 = vpow2.f32 %v658_v24  ;;  %v606_v53 = vsub.f32 %v1896_v48, %v572_v51  ;;  %v607_v57 = vsub.f32 %v1898_v49, %v572_v51  ;;  %v702_v44 = vadd.f32 %v1994_v45, %v1992_v43 }
 0x29b   : > { %1228 = vpow2.f32 %v660_v41  ;;  %v575_v46 = vpop.xlane.xlu0 %574  ;;  %v815_v42 = vcombine.high %v2053_v39, %v2053_v39 }
 0x29c   : > { %v2000_v59 = vpop.eup %1218  ;;  %v662_v28 = vmul.f32 1.442695, %v606_v53  ;;  %v664_v60 = vmul.f32 1.442695, %v607_v57  ;;  %703 = vadd.xlane.f32.xlu1 %v702_v44  ;;  %v608_v62 = vsub.f32 %v1900_v50, %v575_v46  ;;  %v609_v63 = vsub.f32 %v1904_v52, %v575_v46 }
 0x29d   : > { %v2004_v0 = vpop.eup %1220  ;;  %850 = vmatprep.mubr.bf16.mxu1 %v815_v42 }
 0x29e   : > { %1230 = vpow2.f32 %v662_v28  ;;  %v666_v48 = vmul.f32 1.442695, %v608_v62  ;;  %v668_v30 = vmul.f32 1.442695, %v609_v63  ;;  %v705_v49 = vadd.f32 %v2004_v0, %v2000_v59 }
 0x29f   : > { %1232 = vpow2.f32 %v664_v60 }
 0x2a0   : > { %v2008_v1 = vpop.eup %1222  ;;  %1234 = vpow2.f32 %v666_v48  ;;  %706 = vadd.xlane.f32.xlu0 %v705_v49 }
 0x2a1   : > { %v2010_v2 = vpop.eup %1224  ;;  %1236 = vpow2.f32 %v668_v30  ;;  %v578_v4 = vpop.xlane.xlu1 %577 }
 0x2a2   : > { %v610_v50 = vsub.f32 %v1908_v54, %v578_v4  ;;  %v611_v52 = vsub.f32 %v1910_v55, %v578_v4  ;;  %v708_v5 = vadd.f32 %v2010_v2, %v2008_v1 }
 0x2a3   : > { %v581_v6 = vpop.xlane.xlu0 %580 }
 0x2a4   : > { %v2016_v32 = vpop.eup %1226  ;;  %v670_v7 = vmul.f32 1.442695, %v610_v50  ;;  %v672_v8 = vmul.f32 1.442695, %v611_v52  ;;  %709 = vadd.xlane.f32.xlu1 %v708_v5  ;;  %v612_v10 = vsub.f32 %v1912_v56, %v581_v6  ;;  %v613_v11 = vsub.f32 %v1916_v58, %v581_v6 }
 0x2a5   : > { %v2020_v12 = vpop.eup %1228 }
 0x2a6   : > { %1238 = vpow2.f32 %v670_v7  ;;  %v674_v36 = vmul.f32 1.442695, %v612_v10  ;;  %v676_v54 = vmul.f32 1.442695, %v613_v11  ;;  %v711_v55 = vadd.f32 %v2020_v12, %v2016_v32 }
 0x2a7   : > { %1240 = vpow2.f32 %v672_v8 }
 0x2a8   : > { %v2024_v13 = vpop.eup %1230  ;;  %1242 = vpow2.f32 %v674_v36  ;;  %712 = vadd.xlane.f32.xlu0 %v711_v55 }
 0x2a9   : > { %v2026_v15 = vpop.eup %1232  ;;  %1244 = vpow2.f32 %v676_v54 }
 0x2aa   : > { %v2028_v56 = vpop.eup %1234  ;;  %v714_v58 = vadd.f32 %v2026_v15, %v2024_v13 }
 0x2ab   : > { %v2032_v21 = vpop.eup %1236 }
 0x2ac   : > { %715 = vadd.xlane.f32.xlu1 %v714_v58  ;;  %v717_v18 = vadd.f32 %v2032_v21, %v2028_v56 }
 0x2ae   : > { %718 = vadd.xlane.f32.xlu0 %v717_v18 }
 0x2b0   : > { %v2036_v19 = vpop.eup %1238 }
 0x2b1   : > { %v2038_v38 = vpop.eup %1240 }
 0x2b2   : > { %v2040_v20 = vpop.eup %1242  ;;  %v720_v22 = vadd.f32 %v2038_v38, %v2036_v19 }
 0x2b3   : > { %v2044_v33 = vpop.eup %1244 }
 0x2b4   : > { %721 = vadd.xlane.f32.xlu1 %v720_v22  ;;  %v723_v35 = vadd.f32 %v2044_v33, %v2040_v20 }
 0x2b6   : > { %724 = vadd.xlane.f32.xlu0 %v723_v35 }
 0x309   : > { %v680_v24 = vpop.xlane.xlu1 %679 }
 0x30a   : > { %1246 = vrcp.f32 %v680_v24 }
 0x30b   : > { %v683_v41 = vpop.xlane.xlu0 %682 }
 0x30c   : > { %1248 = vrcp.f32 %v683_v41 }
 0x311   : > { %v686_v51 = vpop.xlane.xlu1 %685 }
 0x312   : > { %1250 = vrcp.f32 %v686_v51 }
 0x314   : > { %v1247_v53 = vpop.eup %1246 }
 0x315   : > { %v689_v57 = vpop.xlane.xlu0 %688  ;;  %v759_v46 = vmul.f32 %v1247_v53, %v1930_v17  ;;  %v758_v60 = vmul.f32 %v1247_v53, %v1928_v14 }
 0x316   : > { %v1249_v44 = vpop.eup %1248  ;;  %1252 = vrcp.f32 %v689_v57 }
 0x317   : > { %v761_v28 = vmul.f32 %v1249_v44, %v1938_v27  ;;  %v760_v62 = vmul.f32 %v1249_v44, %v1932_v23 }
 0x319   : > { %v692_v63 = vpop.xlane.xlu1 %691  ;;  %v791_v48 = vpack.c.bf16 %v761_v28, %v759_v46  ;;  %v790_v30 = vpack.c.bf16 %v760_v62, %v758_v60 }
 0x31a   : > { %1254 = vrcp.f32 %v692_v63 }
 0x31b   : > { %818 = vmatprep.subr.bf16.mxu1 %v791_v48 }
 0x31c   : > { %819 = vmatpush1.bf16.xpose.msra.mxu1 %v790_v30  ;;  %v1251_v4 = vpop.eup %1250 }
 0x31d   : > { %v695_v49 = vpop.xlane.xlu0 %694  ;;  %v763_v5 = vmul.f32 %v1251_v4, %v1946_v47  ;;  %v762_v27 = vmul.f32 %v1251_v4, %v1944_v25 }
 0x31e   : > { %1256 = vrcp.f32 %v695_v49 }
 0x320   : > { %v1253_v50 = vpop.eup %1252 }
 0x321   : > { %v698_v52 = vpop.xlane.xlu1 %697  ;;  %v765_v17 = vmul.f32 %v1253_v50, %v1954_v61  ;;  %v764_v14 = vmul.f32 %v1253_v50, %v1952_v26 }
 0x322   : > { %1258 = vrcp.f32 %v698_v52 }
 0x323   : > { %v793_v23 = vpack.c.bf16 %v765_v17, %v763_v5  ;;  %v792_v6 = vpack.c.bf16 %v764_v14, %v762_v27 }
 0x324   : > { %v1255_v8 = vpop.eup %1254 }
 0x325   : > { %820 = vmatprep.subr.bf16.mxu1 %v793_v23  ;;  %v701_v7 = vpop.xlane.xlu0 %700  ;;  %v767_v36 = vmul.f32 %v1255_v8, %v1962_v3  ;;  %v766_v61 = vmul.f32 %v1255_v8, %v1960_v31  ;;  %v859_v23 = vstv %s858_s2 }
 0x326   : > { %1260 = vrcp.f32 %v701_v7  ;;  %821 = vmatpush1.bf16.xpose.msra.mxu1 %v792_v6 }
 0x328   : > { %v1257_v10 = vpop.eup %1256 }
 0x329   : > { %v704_v11 = vpop.xlane.xlu1 %703  ;;  %v769_v47 = vmul.f32 %v1257_v10, %v1970_v9  ;;  %v768_v25 = vmul.f32 %v1257_v10, %v1968_v34 }
 0x32a   : > { %1262 = vrcp.f32 %v704_v11 }
 0x32b   : > { %v795_v54 = vpack.c.bf16 %v769_v47, %v767_v36  ;;  %v794_v26 = vpack.c.bf16 %v768_v25, %v766_v61 }
 0x32c   : > { %v1259_v58 = vpop.eup %1258 }
 0x32d   : > { %822 = vmatprep.subr.bf16.mxu1 %v795_v54  ;;  %v707_v55 = vpop.xlane.xlu0 %706  ;;  %v771_v35 = vmul.f32 %v1259_v58, %v1978_v16  ;;  %v770_v9 = vmul.f32 %v1259_v58, %v1976_v37 }
 0x32e   : > { %1264 = vrcp.f32 %v707_v55  ;;  %823 = vmatpush1.bf16.xpose.msra.mxu1 %v794_v26 }
 0x330   : > { %v1261_v18 = vpop.eup %1260 }
 0x331   : > { %v710_v22 = vpop.xlane.xlu1 %709  ;;  %v773_v3 = vmul.f32 %v1261_v18, %v1986_v29  ;;  %v772_v31 = vmul.f32 %v1261_v18, %v1984_v40 }
 0x332   : > { %1266 = vrcp.f32 %v710_v22 }
 0x333   : > { %v797_v42 = vpack.c.bf16 %v773_v3, %v771_v35  ;;  %v796_v34 = vpack.c.bf16 %v772_v31, %v770_v9 }
 0x334   : > { %v1263_v41 = vpop.eup %1262 }
 0x335   : > { %824 = vmatprep.subr.bf16.mxu1 %v797_v42  ;;  %v713_v24 = vpop.xlane.xlu0 %712  ;;  %v775_v57 = vmul.f32 %v1263_v41, %v1994_v45  ;;  %v774_v29 = vmul.f32 %v1263_v41, %v1992_v43 }
 0x336   : > { %1268 = vrcp.f32 %v713_v24  ;;  %825 = vmatpush1.bf16.xpose.msra.mxu1 %v796_v34 }
 0x338   : > { %v1265_v51 = vpop.eup %1264 }
 0x339   : > { %v716_v53 = vpop.xlane.xlu1 %715  ;;  %v777_v16 = vmul.f32 %v1265_v51, %v2004_v0  ;;  %v776_v37 = vmul.f32 %v1265_v51, %v2000_v59 }
 0x33a   : > { %1270 = vrcp.f32 %v716_v53 }
 0x33b   : > { %v719_v40 = vpop.xlane.xlu0 %718  ;;  %v799_v44 = vpack.c.bf16 %v777_v16, %v775_v57  ;;  %v798_v46 = vpack.c.bf16 %v776_v37, %v774_v29 }
 0x33c   : > { %1272 = vrcp.f32 %v719_v40  ;;  %v1267_v28 = vpop.eup %1266 }
 0x33d   : > { %826 = vmatprep.subr.bf16.mxu1 %v799_v44  ;;  %v779_v63 = vmul.f32 %v1267_v28, %v2010_v2  ;;  %v778_v0 = vmul.f32 %v1267_v28, %v2008_v1 }
 0x33e   : > { %827 = vmatpush1.bf16.xpose.msra.mxu1 %v798_v46 }
 0x340   : > { %v1269_v60 = vpop.eup %1268 }
 0x341   : > { %v722_v62 = vpop.xlane.xlu1 %721  ;;  %v781_v45 = vmul.f32 %v1269_v60, %v2020_v12  ;;  %v780_v43 = vmul.f32 %v1269_v60, %v2016_v32 }
 0x342   : > { %1274 = vrcp.f32 %v722_v62 }
 0x343   : > { %v725_v59 = vpop.xlane.xlu0 %724  ;;  %v801_v48 = vpack.c.bf16 %v781_v45, %v779_v63  ;;  %v800_v30 = vpack.c.bf16 %v780_v43, %v778_v0 }
 0x344   : > { %v1271_v49 = vpop.eup %1270  ;;  %1276 = vrcp.f32 %v725_v59 }
 0x345   : > { %828 = vmatprep.subr.bf16.mxu1 %v801_v48  ;;  %v783_v50 = vmul.f32 %v1271_v49, %v2026_v15  ;;  %v782_v1 = vmul.f32 %v1271_v49, %v2024_v13 }
 0x346   : > { %v1273_v4 = vpop.eup %1272  ;;  %829 = vmatpush1.bf16.xpose.msra.mxu1 %v800_v30 }
 0x347   : > { %v785_v52 = vmul.f32 %v1273_v4, %v2032_v21  ;;  %v784_v2 = vmul.f32 %v1273_v4, %v2028_v56 }
 0x349   : > { %v803_v12 = vpack.c.bf16 %v785_v52, %v783_v50  ;;  %v802_v5 = vpack.c.bf16 %v784_v2, %v782_v1 }
 0x34b   : > { %830 = vmatprep.subr.bf16.mxu1 %v803_v12 }
 0x34c   : > { %v1275_v32 = vpop.eup %1274 }
 0x34d   : > { %v787_v27 = vmul.f32 %v1275_v32, %v2038_v38  ;;  %v786_v56 = vmul.f32 %v1275_v32, %v2036_v19  ;;  %v861_v38 = vld [vmem:[%s1810_s17] sm:$0xf]  ;;  %s1372_s17 = sshll.u32 %s1508_s15, 4  ;;  %s1373_s17 = int_to_ptr.vmem [resolvable:$false] %s1372_s17 }
 0x34e   : > { %v1277_v17 = vpop.eup %1276  ;;  %831 = vmatpush1.bf16.xpose.msra.mxu1 %v802_v5  ;;  %s1374_s30 = scalar_lea.vmem %s1373_s17, 128  ;;  %p1375_p9 = scmp.lt.s32.totalorder %s2100_s0, %s1373_s17 }
 0x34f   : > { %v789_v15 = vmul.f32 %v1277_v17, %v2044_v33  ;;  %v788_v21 = vmul.f32 %v1277_v17, %v2040_v20  ;;  %p1376_p11 = scmp.lt.s32.totalorder %s1374_s30, %s1368_s16 }
 0x351   : > { %v805_v14 = vpack.c.bf16 %v789_v15, %v787_v27  ;;  %v804_v13 = vpack.c.bf16 %v788_v21, %v786_v56  ;;  %p1377_p6 = por %p1376_p11, %p1375_p9 }
 0x353   : > { %832 = vmatprep.subr.bf16.mxu1 %v805_v14  ;;  %p1378_p2 = pnand %p1377_p6, %p1371_p5 }
 0x356   : > { %833 = vmatpush1.bf16.xpose.msra.mxu1 %v804_v13 }
 0x35d   : > { %851 = vmatmul.mubr.bf16.vlgmr.msra.gmra.mrb[0].mxu1 %v2053_v39 }
 0x430   : > { %v852_v6 = vpop.f32.mrb[0].mxu1 }
 0x431   : > { %v860_v20 = vmul.f32 %v859_v23, %v852_v6  ;;  %v854_v33 = vpop.f32.mrb[1].mxu1 }
 0x432   : > { %v855_v19 = vpop.f32.mrb[2].mxu1 }
 0x433   : > { %v862_v7 = vadd.f32 %v861_v38, %v860_v20  ;;  %v856_v8 = vpop.f32.mrb[3].mxu1 }
 0x435   : > { %863 = vst [vmem:[%s353_s3] sm:$0xf] %v862_v7 }
 0x436   : > { %1381 = shalt.err (!%p1378_p2)
}
 0x437   : > { %s1382_s23 = scalar_lea.hbm %s2098_s7, 64  ;;  %s1386_s11 = scalar_lea.hbm %s2225_s13, 256 }
 0x438   : > { %p1383_p0 = scmp.ne.s32.totalorder %s2098_s7, %s1382_s23  ;;  %p1387_p12 = scmp.lt.u32.totalorder %s2098_s7, %s2225_s13 }
 0x439   : > { %p1388_p4 = scmp.lt.u32.totalorder %s1386_s11, %s1382_s23  ;;  %p1390_p13 = scmp.lt.u32.totalorder %s1382_s23, %s2098_s7 }
 0x43a   : > { %p1384_p1 = pnand %p1383_p0, %p2226_p10 }
 0x43b   : > { %p1389_p8 = por %p1388_p4, %p1387_p12 }
 0x43c   : > { %p1385_p7 = pneg %p1384_p1 }
 0x43d   : > { %p1391_p3 = por %p1390_p13, %p1389_p8 }
 0x43f   : > { %p1392_p5 = pnand %p1391_p3, %p1385_p7 }
 0x441   : > { %1395 = shalt.err (!%p1392_p5)
}
 0x442   : > { %1067 = dma.vmem_to_hbm [thread:$0]  (%p2226_p10), %s2100_s0, 64, %s2098_s7, %s865_s8  }
 0x443 PF: > { %s2227_s6 = sld [smem:[#allocation14_spill]]  ;;  %s2228_s12 = sld [smem:[#allocation22_spill]] }
 0x444   : > { %p1084_p9 = scmp.ge.s32.totalorder %s1498_s29, 2 }
 0x449   : > { %s892_s2 = sand.u32 1, %s2227_s6   ;;  %p2229_p11 = scmp.ne.s32.totalorder %s2228_s12, 0 }
 0x44a   : > { %s893_s5 = scalar_lea.sflag [#allocation5], %s892_s2 }
 0x44b   : > { %p1080_p6 = pnand %p1084_p9, %p2229_p11 }
 0x44d   : > { %1453 = dma.done.wait (!%p1080_p6), %s893_s5, 64  }
 0x44e   : > { %1455 = vsyncadd (!%p1080_p6), %s893_s5, 4294967232  ;;  %s25_s29 = sadd.s32 1, %s1498_s29   ;;  %s2230_s25 = sld [smem:[#allocation23_spill]] }
 0x44f   : > { %p22_p2 = scmp.ge.s32.totalorder %s25_s29, 6   ;;  %s2231_s9 = sld [smem:[#allocation15_spill]] }
 0x450   : > { %s2232_s3 = sld [smem:[#allocation24_spill]]  ;;  %s2233_s1 = sld [smem:[#allocation19_spill]] }
 0x451   : > { %s2234_s19 = sld [smem:[#allocation21_spill]]  ;;  %s2235_s20 = smov %s1462_s21 }
 0x452   : > { %s2236_s21 = smov %s1466_s22  ;;  %s2238_s23 = smov %s1474_s24 }
 0x453   : > { %s2241_s26 = smov %s1490_s27  ;;  %s2242_s0 = smov %s1494_s28 }
 0x454   : > { %s2237_s22 = smov %s2230_s25  ;;  %24 = sbr.rel (!%p22_p2) target bundleno = 17 (0x11), region = 112 }
 0x455   : > { %s2239_s24 = smov %s2231_s9 }
 0x456   : > { %s2240_s25 = smov %s2232_s3  ;;  %s2243_s27 = smov %s2233_s1 }
 0x457   : > { %s2244_s28 = smov %s2234_s19 }
 0x45b   :  { %898 = vsyncpa [#allocation4], 1 }
 0x45c   :  { %900 = vsyncpa [#allocation4 + $0x1], 1 }
 0x45d   :  { %901 = vsyncpa [#allocation7], 1 }
 0x45e   :  { %903 = vsyncpa [#allocation7 + $0x1], 1 }
 0x45f   :  { %904 = vsyncpa [#allocation5], 1 }
 0x460   :  { %906 = vsyncpa [#allocation5 + $0x1], 1 }

</bundles_post_ra>
